<compile_context>
chip_gen: v7x
topology: tpu7x:2x2x1
jax: 0.10.0
libtpu: 0.0.40
codegen_flags: <defaults>
</compile_context>

<pallas_src>
import functools

import jax
import jax.numpy as jnp
from jax.experimental import pallas as pl
from jax.experimental.pallas import tpu as pltpu


# ---------------------------------------------------------------------------
# Hardware-aware heuristics
# ---------------------------------------------------------------------------

def _num_tensorcores():
    """Best-effort count of TensorCores addressable by one pallas_call."""
    try:
        kind = jax.devices()[0].device_kind.lower()
    except Exception:
        return 1
    if "lite" in kind or "v5e" in kind or "v6e" in kind:
        return 1                      # v5e / v6e: single TensorCore per chip
    if "7" in kind or "v4" in kind or "v5p" in kind:
        return 2                      # v7x (2 TCs) and v4/v5p megacore
    return 1


# A (40, lb) f32 value is 5*(lb/128) vregs.  The forward RHS keeps ~4-5 live,
# the accumulator-style RK4 body ~4, so lb=256 stays comfortably inside the
# 64-vreg file; anything larger starts spilling.
_FWD_LANE_CAP = 256
_RK4_LANE_CAP = 256


def _pick_lane_block(e, *, cap, n_cores):
    """Width of an ensemble (lane-axis) block.

    * divisor of e, multiple of 128 when possible (unmasked vst)
    * <= cap (vreg pressure)
    * on multi-TC chips, small enough that the grid has >= n_cores blocks
    * on single-TC chips, as large as possible (fewest grid steps)
    """
    if e % 128 != 0:
        return e                      # tiny / irregular: one full-extent block
    cands = [w for w in (512, 384, 256, 128) if w <= cap and e % w == 0]
    if not cands:
        return 128
    if n_cores > 1:
        for w in cands:               # biggest width that still splits n_cores ways
            if e // w >= n_cores:
                return w
        return cands[-1]
    return cands[0]                   # single TC: one (or few) big blocks


def _maybe_pad_lanes(x, n_cores):
    """Lane-pad the ensemble so each TensorCore can get a full 128-lane block."""
    n, e = x.shape
    if n_cores <= 1 or e % 128 != 0:
        return x, e
    quantum = 128 * n_cores
    if e % quantum == 0:
        return x, e
    pad = quantum - (e % quantum)
    return jnp.pad(x, ((0, 0), (0, pad))), e


# ---------------------------------------------------------------------------
# In-kernel math
# ---------------------------------------------------------------------------

def _roll_sites(x, shift):
    """Circular roll along axis 0 (the site axis); same semantics as jnp.roll."""
    n = x.shape[0]
    s = shift % n
    if s == 0:
        return x
    # Native-tile aligned ((8, 128) for f32): a single XLU sublane rotate that
    # co-issues with the VPU work.
    if x.shape[0] % 8 == 0 and x.shape[1] % 128 == 0:
        return pltpu.roll(x, s, 0)
    # Fallback (not exercised at the validated f32 / N=40 / 128k-lane shapes).
    return jnp.roll(x, s, axis=0)


def _l96_rhs(x, F):
    """Lorenz-96 RHS for a (N_sites, E_members) block (sites on sublanes)."""
    xp1 = _roll_sites(x, -1)          # x[(i+1) % N]
    xm2 = _roll_sites(x, 2)           # x[(i-2) % N]
    xm1 = _roll_sites(x, 1)           # x[(i-1) % N]
    return (xp1 - xm2) * xm1 - x + F


# ---------------------------------------------------------------------------
# Kernels (F / dt / steps baked in as compile-time constants via partial)
# ---------------------------------------------------------------------------

def _deriv_kernel(x_ref, o_ref, *, F):
    o_ref[...] = _l96_rhs(x_ref[...], F)


def _rk4_kernel(x_ref, o_ref, *, F, dt, steps, unroll):
    half_dt = 0.5 * dt

    def step(_, x):
        # Running-accumulator combine: k1..k3 die as soon as they're consumed,
        # keeping peak live arrays at ~4 full (N, lb) values (no spills).
        k = _l96_rhs(x, F)                     # k1
        acc = k
        k = _l96_rhs(x + half_dt * k, F)       # k2
        acc = acc + 2.0 * k
        k = _l96_rhs(x + half_dt * k, F)       # k3
        acc = acc + 2.0 * k
        k = _l96_rhs(x + dt * k, F)            # k4
        return x + (dt / 6.0) * (acc + k)

    o_ref[...] = jax.lax.fori_loop(0, steps, step, x_ref[...], unroll=unroll)


# ---------------------------------------------------------------------------
# pallas_call wrappers
# ---------------------------------------------------------------------------

@functools.partial(jax.jit, static_argnames=("F", "n_cores"))
def _forward_batched(states_ne, *, F, n_cores):
    states_p, e0 = _maybe_pad_lanes(states_ne, n_cores)
    n, e = states_p.shape
    lb = _pick_lane_block(e, cap=_FWD_LANE_CAP, n_cores=n_cores)
    out = pl.pallas_call(
        functools.partial(_deriv_kernel, F=F),
        out_shape=jax.ShapeDtypeStruct((n, e), states_p.dtype),
        grid_spec=pltpu.PrefetchScalarGridSpec(
            num_scalar_prefetch=0,
            grid=(e // lb,),
            in_specs=[pl.BlockSpec((n, lb), lambda j: (0, j))],
            out_specs=pl.BlockSpec((n, lb), lambda j: (0, j)),
        ),
        compiler_params=pltpu.CompilerParams(
            dimension_semantics=("parallel",)),
    )(states_p)
    return out[:, :e0] if e0 != e else out


@functools.partial(jax.jit, static_argnames=("F",))
def _forward_single(state, *, F):
    # (N,) parity path routed through the lane-dense batched kernel:
    # 128 identical lanes -> unmasked stores; take lane 0 of the result.
    n = state.shape[0]
    slab = jnp.broadcast_to(state[:, None], (n, 128))
    return _forward_batched(slab, F=F, n_cores=1)[:, 0]


@functools.partial(jax.jit, static_argnames=("F", "dt", "steps", "n_cores"))
def _rk4_batched(states_ne, *, F, dt, steps, n_cores):
    states_p, e0 = _maybe_pad_lanes(states_ne, n_cores)
    n, e = states_p.shape
    lb = _pick_lane_block(e, cap=_RK4_LANE_CAP, n_cores=n_cores)
    unroll = True if steps <= 8 else 4
    out = pl.pallas_call(
        functools.partial(_rk4_kernel, F=F, dt=dt, steps=steps, unroll=unroll),
        out_shape=jax.ShapeDtypeStruct((n, e), states_p.dtype),
        grid_spec=pltpu.PrefetchScalarGridSpec(
            num_scalar_prefetch=0,
            grid=(e // lb,),
            in_specs=[pl.BlockSpec((n, lb), lambda j: (0, j))],
            out_specs=pl.BlockSpec((n, lb), lambda j: (0, j)),
        ),
        compiler_params=pltpu.CompilerParams(
            dimension_semantics=("parallel",)),
        input_output_aliases={0: 0},   # update the state slab in place
    )(states_p)
    return out[:, :e0] if e0 != e else out


# ---------------------------------------------------------------------------
# Module-level wrapper (parity with the PyTorch nn.Module)
# ---------------------------------------------------------------------------

class Lorenz96:
    """Pallas TPU port of the PyTorch Lorenz96 module.

    forward(t, state):
      * state of shape (N,)   -> dstate/dt of shape (N,)      (module parity)
      * state of shape (N, E) -> per-member dstate/dt, (N, E) (lane-dense ensemble)
    """

    def __init__(self, *args):
        self.F = float(args[0])
        self._n_cores = _num_tensorcores()

    def forward(self, t, state):
        del t  # unused, as in the PyTorch module
        state = jnp.asarray(state)
        if state.ndim == 1:
            return _forward_single(state, F=self.F)
        if state.ndim == 2:
            return _forward_batched(state, F=self.F, n_cores=self._n_cores)
        raise ValueError("state must have shape (N,) or (N, E)")

    __call__ = forward

    def observe(self, u):
        return u  # identity, as in the PyTorch module

    def integrate_rk4(self, state, dt, steps):
        """Run `steps` fused RK4 steps inside ONE pallas_call."""
        state = jnp.asarray(state)
        squeeze = state.ndim == 1
        if squeeze:
            state = jnp.broadcast_to(state[:, None], (state.shape[0], 128))
        out = _rk4_batched(state, F=self.F, dt=float(dt), steps=int(steps),
                           n_cores=self._n_cores)
        return out[:, 0] if squeeze else out


if __name__ == "__main__":
    key = jax.random.PRNGKey(0)
    k1, k2 = jax.random.split(key)

    N = 40          # classic Lorenz-96 dimension
    F = 8.0         # forcing term (args[0] of the torch __init__)
    E = 256         # ensemble members (lane-dense: multiple of 128)

    model = Lorenz96(F)

    # ---- 1) single-state forward (exact parity with the torch module) ----
    state = jax.random.normal(k1, (N,), dtype=jnp.float32)
    out = jax.block_until_ready(model.forward(0.0, state))
    ref = (jnp.roll(state, -1) - jnp.roll(state, 2)) * jnp.roll(state, 1) - state + F
    assert out.shape == state.shape and out.dtype == state.dtype
    assert jnp.allclose(out, ref, atol=1e-5, rtol=1e-5)

    # ---- 2) lane-dense ensemble forward: (N, E) with members on lanes ----
    states = jax.random.normal(k2, (N, E), dtype=jnp.float32)
    outs = jax.block_until_ready(model.forward(0.0, states))
    refs = ((jnp.roll(states, -1, 0) - jnp.roll(states, 2, 0))
            * jnp.roll(states, 1, 0) - states + F)
    assert outs.shape == (N, E) and outs.dtype == states.dtype
    assert jnp.allclose(outs, refs, atol=1e-5, rtol=1e-5)

    # ---- 3) fused RK4 integrator: many derivative evals per pallas_call ----
    dt, steps = 0.01, 20
    fused = jax.block_until_ready(model.integrate_rk4(states, dt, steps))

    def rhs(x):
        return (jnp.roll(x, -1, 0) - jnp.roll(x, 2, 0)) * jnp.roll(x, 1, 0) - x + F

    xr = states
    for _ in range(steps):
        a = rhs(xr)
        b = rhs(xr + 0.5 * dt * a)
        c = rhs(xr + 0.5 * dt * b)
        d = rhs(xr + dt * c)
        xr = xr + (dt / 6.0) * (a + 2.0 * b + 2.0 * c + d)
    assert fused.shape == (N, E)
    assert jnp.allclose(fused, xr, atol=1e-3, rtol=1e-3)

    print("KERNEL_OK")
</pallas_src>

<mosaic_0001>
module attributes {stable_mosaic.version = 11 : i64} {
  func.func @_deriv_kernel(%arg0: i32, %arg1: memref<40x128xf32, #tpu.memory_space<vmem>>, %arg2: memref<40x128xf32, #tpu.memory_space<vmem>>) attributes {dimension_semantics = [#tpu.dimension_semantics<parallel>], iteration_bounds = array<i64: 1>, scalar_prefetch = 0 : i64, scratch_operands = 0 : i64, tpu.core_type = #tpu.core_type<tc>, window_params = [{transform_indices = @transform_0, window_bounds = array<i64: 40, 128>}, {transform_indices = @transform_1, window_bounds = array<i64: 40, 128>}]} {
    %c0 = arith.constant 0 : index
    %c0_0 = arith.constant 0 : index
    %0 = vector.load %arg1[%c0, %c0_0] : memref<40x128xf32, #tpu.memory_space<vmem>>, vector<40x128xf32>
    %c39_i32 = arith.constant 39 : i32
    %1 = tpu.dynamic_rotate %0 by %c39_i32 dim 0 : vector<40x128xf32>, i32 -> vector<40x128xf32>
    %c2_i32 = arith.constant 2 : i32
    %2 = tpu.dynamic_rotate %0 by %c2_i32 dim 0 : vector<40x128xf32>, i32 -> vector<40x128xf32>
    %c1_i32 = arith.constant 1 : i32
    %3 = tpu.dynamic_rotate %0 by %c1_i32 dim 0 : vector<40x128xf32>, i32 -> vector<40x128xf32>
    %4 = arith.subf %1, %2 : vector<40x128xf32>
    %5 = arith.mulf %4, %3 : vector<40x128xf32>
    %6 = arith.subf %5, %0 : vector<40x128xf32>
    %cst = arith.constant 8.000000e+00 : f32
    %7 = vector.broadcast %cst : f32 to vector<40x128xf32>
    %8 = arith.addf %6, %7 : vector<40x128xf32>
    %c0_1 = arith.constant 0 : index
    %c0_2 = arith.constant 0 : index
    %9 = vector.load %arg2[%c0_1, %c0_2] : memref<40x128xf32, #tpu.memory_space<vmem>>, vector<40x128xf32>
    tpu.vector_store %arg2[%c0_1, %c0_2], %8 {strides = array<i32>} : memref<40x128xf32, #tpu.memory_space<vmem>>, vector<40x128xf32>,
    return
  }
  func.func @transform_0(%arg0: i32) -> (i32, i32) {
    %c0_i32 = arith.constant 0 : i32
    %c0_i32_0 = arith.constant 0 : i32
    return %c0_i32, %arg0 : i32, i32
  }
  func.func @transform_1(%arg0: i32) -> (i32, i32) {
    %c0_i32 = arith.constant 0 : i32
    %c0_i32_0 = arith.constant 0 : i32
    return %c0_i32, %arg0 : i32, i32
  }
}

</mosaic_0001>

<bundles_post_ra>
// kernel: _forward_batched.1
= control target key start
LH: loop header
LB: loop body
LE: loop exit
PB: predicated region body
PF: predicated region fallthrough
CT: control target
= control target key end

     0   :  { %6 = vsyncpa [#allocation3], 0  ;;  %s216_s0 = inlined_call_operand.hbm [shape: f32[40,128], index: 0, kind: input, shape index: {}]   ;;  %s217_s1 = inlined_call_operand.hbm [shape: f32[40,128], index: 1, kind: output, shape index: {}]  }
   0x1   :  { %7 = vsyncpa [#allocation4], 0  ;;  %s157_s6 = smov [#allocation2]   ;;  %s109_s10 = scalar_lea.hbm %s216_s0, 640 }
   0x2   :  { %s13_s7 = sshll.u32 %s157_s6, 4  ;;  %p110_p0 = scmp.ne.s32.totalorder %s216_s0, %s109_s10  ;;  %s14_s7 = int_to_ptr.vmem [resolvable:$true] %s13_s7 }
   0x3   :  { %p113_p1 = scmp.lt.u32.totalorder %s109_s10, %s216_s0 }
   0x5   :  { %p115_p2 = pnand %p113_p1, %p110_p0 }
   0x7   :  { %118 = shalt.err (!%p115_p2)
}
   0x8   :  { %s119_s15 = scalar_lea.vmem %s14_s7, 640  ;;  %p124_p4 = scmp.lt.s32.totalorder %s14_s7, %s14_s7 }
   0x9   :  { %p120_p3 = scmp.ne.s32.totalorder %s14_s7, %s119_s15  ;;  %p125_p5 = scmp.lt.s32.totalorder %s119_s15, %s119_s15 }
   0xb   :  { %p126_p6 = por %p125_p5, %p124_p4 }
   0xd   :  { %p127_p7 = pnand %p126_p6, %p120_p3 }
   0xf   :  { %130 = shalt.err (!%p127_p7)
}
  0x10   :  { %s158_s16 = smov 128   ;;  %s159_s17 = smov 8  }
  0x11   :  { %19 = dma.hbm_to_vmem [thread:$0]  %s216_s0, 640, %s14_s7, [#allocation3], %s158_s16, %s158_s16, %s159_s17  }
  0x12   :  { %153 = dma.done.wait [#allocation3], 640  }
  0x13   :  { %154 = vsyncadd [#allocation3], 4294966656  ;;  %v33_v0 = vlaneseq  ;;  %v23_v2 = vld [vmem:[#allocation2] sm:$0xff]  ;;  %v24_v3 = vld [vmem:[#allocation2 + $0x8] sm:$0xff]  ;;  %s160_s0 = smov [#allocation5]  }
  0x14   :  { %v27_v4 = vld [vmem:[#allocation2 + $0x20] sm:$0xff]  ;;  %v28_v5 = vrot.slane %v23_v2, 1  ;;  %v29_v6 = vrot.slane %v24_v3, 1  ;;  %v41_v7 = vrot.slane %v23_v2, 6  ;;  %v25_v9 = vld [vmem:[#allocation2 + $0x10] sm:$0xff]  ;;  %v26_v10 = vld [vmem:[#allocation2 + $0x18] sm:$0xff] }
  0x15   :  { %v34_v1 = vshrl.u32 %v33_v0, 7  ;;  %v45_v8 = vrot.slane %v27_v4, 6  ;;  %v52_v11 = vrot.slane %v23_v2, 7  ;;  %v56_v12 = vrot.slane %v27_v4, 7  ;;  %s93_s20 = sshll.u32 %s160_s0, 4  ;;  %s94_s20 = int_to_ptr.vmem [resolvable:$true] %s93_s20 }
  0x16   :  { %v30_v13 = vrot.slane %v25_v9, 1  ;;  %v42_v14 = vrot.slane %v24_v3, 6  ;;  %v53_v17 = vrot.slane %v24_v3, 7  ;;  %v31_v18 = vrot.slane %v26_v10, 1  ;;  %s131_s21 = scalar_lea.vmem %s94_s20, 640  ;;  %p136_p9 = scmp.lt.s32.totalorder %s94_s20, %s94_s20 }
  0x17   :  { %vm35_vm0 = vcmp.lt.s32.totalorder %v34_v1, 7  ;;  %vm46_vm1 = vcmp.lt.s32.totalorder %v34_v1, 2  ;;  %vm57_vm2 = vcmp.lt.s32.totalorder %v34_v1, 1  ;;  %v43_v26 = vrot.slane %v25_v9, 6  ;;  %p132_p8 = scmp.ne.s32.totalorder %s94_s20, %s131_s21  ;;  %p137_p10 = scmp.lt.s32.totalorder %s131_s21, %s131_s21 }
  0x18   :  { %v39_v15 = vsel %vm35_vm0, %v28_v5, %v29_v6  ;;  %v51_v16 = vsel %vm46_vm1, %v45_v8, %v41_v7  ;;  %v62_v19 = vsel %vm57_vm2, %v56_v12, %v52_v11  ;;  %v38_v21 = vsel %vm35_vm0, %v29_v6, %v30_v13 }
  0x19   :  { %v63_v20 = vsub.f32 %v39_v15, %v51_v16  ;;  %v50_v22 = vsel %vm46_vm1, %v41_v7, %v42_v14  ;;  %v61_v23 = vsel %vm57_vm2, %v52_v11, %v53_v17  ;;  %v37_v25 = vsel %vm35_vm0, %v30_v13, %v31_v18  ;;  %p138_p11 = por %p137_p10, %p136_p9 }
  0x1a   :  { %v64_v24 = vsub.f32 %v38_v21, %v50_v22  ;;  %v54_v28 = vrot.slane %v25_v9, 7  ;;  %v32_v29 = vrot.slane %v27_v4, 1  ;;  %v44_v30 = vrot.slane %v26_v10, 6 }
  0x1b   :  { %v68_v27 = vmul.f32 %v63_v20, %v62_v19  ;;  %v49_v32 = vsel %vm46_vm1, %v42_v14, %v43_v26  ;;  %v55_v33 = vrot.slane %v26_v10, 7  ;;  %p139_p12 = pnand %p138_p11, %p132_p8 }
  0x1c   :  { %v69_v31 = vmul.f32 %v64_v24, %v61_v23  ;;  %v60_v35 = vsel %vm57_vm2, %v53_v17, %v54_v28  ;;  %v65_v36 = vsub.f32 %v37_v25, %v49_v32  ;;  %v36_v37 = vsel %vm35_vm0, %v31_v18, %v32_v29 }
  0x1d   :  { %v73_v34 = vsub.f32 %v68_v27, %v23_v2  ;;  %v48_v39 = vsel %vm46_vm1, %v43_v26, %v44_v30  ;;  %v59_v40 = vsel %vm57_vm2, %v54_v28, %v55_v33  ;;  %v40_v41 = vsel %vm35_vm0, %v32_v29, %v28_v5 }
  0x1e   :  { %v74_v38 = vsub.f32 %v69_v31, %v24_v3  ;;  %v70_v43 = vmul.f32 %v65_v36, %v60_v35  ;;  %v66_v44 = vsub.f32 %v36_v37, %v48_v39  ;;  %v47_v45 = vsel %vm46_vm1, %v44_v30, %v45_v8 }
  0x1f   :  { %v78_v42 = vadd.f32 8.0, %v73_v34  ;;  %v58_v47 = vsel %vm57_vm2, %v55_v33, %v56_v12  ;;  %v67_v48 = vsub.f32 %v40_v41, %v47_v45 }
  0x20   :  { %v79_v46 = vadd.f32 8.0, %v74_v38  ;;  %v75_v49 = vsub.f32 %v70_v43, %v25_v9  ;;  %v71_v50 = vmul.f32 %v66_v44, %v59_v40 }
  0x21   :  { %83 = vst [vmem:[#allocation5] sm:$0xff] %v78_v42  ;;  %v72_v51 = vmul.f32 %v67_v48, %v58_v47 }
  0x22   :  { %84 = vst [vmem:[#allocation5 + $0x8] sm:$0xff] %v79_v46  ;;  %v80_v52 = vadd.f32 8.0, %v75_v49  ;;  %v76_v53 = vsub.f32 %v71_v50, %v26_v10 }
  0x23   :  { %v77_v54 = vsub.f32 %v72_v51, %v27_v4 }
  0x24   :  { %85 = vst [vmem:[#allocation5 + $0x10] sm:$0xff] %v80_v52  ;;  %v81_v55 = vadd.f32 8.0, %v76_v53 }
  0x25   :  { %v82_v56 = vadd.f32 8.0, %v77_v54 }
  0x26   :  { %86 = vst [vmem:[#allocation5 + $0x18] sm:$0xff] %v81_v55 }
  0x27   :  { %87 = vst [vmem:[#allocation5 + $0x20] sm:$0xff] %v82_v56 }
  0x28   :  { %142 = shalt.err (!%p139_p12)
}
  0x29   :  { %s143_s24 = scalar_lea.hbm %s217_s1, 640 }
  0x2a   :  { %p144_p13 = scmp.ne.s32.totalorder %s217_s1, %s143_s24  ;;  %p147_p0 = scmp.lt.u32.totalorder %s143_s24, %s217_s1 }
  0x2c   :  { %p149_p1 = pnand %p147_p0, %p144_p13 }
  0x2e   :  { %152 = shalt.err (!%p149_p1)
}
  0x2f   :  { %99 = dma.vmem_to_hbm [thread:$0]  %s94_s20, 640, %s217_s1, [#allocation4], %s158_s16, %s158_s16, %s159_s17  }
  0x30   :  { %155 = dma.done.wait [#allocation4], 640  }
  0x31   :  { %156 = vsyncadd [#allocation4], 4294966656 }
  0x32   :  { %103 = vsyncpa [#allocation3], 1 }
  0x33   :  { %104 = vsyncpa [#allocation4], 1 }

</bundles_post_ra>
